<compile_context>
chip_gen: v7x
topology: tpu7x:2x2x1
jax: 0.10.0
libtpu: 0.0.40
codegen_flags: <defaults>
</compile_context>

<pallas_src>
import math

import jax
import jax.numpy as jnp
from jax.experimental import pallas as pl
from jax.experimental.pallas import tpu as pltpu

HID1 = 400
HID2 = 300
HID1_PAD = 512   # next multiple of 128
HID2_PAD = 384   # next multiple of 128

_TB_MAX = 1024   # batch tile (rows); activations stay well under scoped VMEM


def _round_up(x, m):
    return (x + m - 1) // m * m


def _pick_batch_tile(B):
    """Largest-ish multiple-of-8 tile <= _TB_MAX that minimizes pad waste."""
    n_tiles = max(1, -(-B // _TB_MAX))           # cdiv
    tb = _round_up(-(-B // n_tiles), 8)          # balance rows per tile
    tb = min(tb, _TB_MAX)
    return tb


def critic_kernel(s_ref, a_ref,
                  w1s_ref, w1a_ref, b1_ref,
                  w2h_ref, w2a_ref, b2_ref,
                  w3_ref, b3_ref,
                  out_ref):
    s16 = s_ref[...].astype(jnp.bfloat16)          # [TB, S]
    a16 = a_ref[...].astype(jnp.bfloat16)          # [TB, A]

    # Layer 1: concat(state, action) @ W1 + b1, ReLU  (concat == split matmul)
    h1 = (jnp.dot(s16, w1s_ref[...], preferred_element_type=jnp.float32)
          + jnp.dot(a16, w1a_ref[...], preferred_element_type=jnp.float32)
          + b1_ref[...])
    h1 = jnp.maximum(h1, 0.0)                      # [TB, 512] f32; lanes 400: are 0

    # Layer 2: concat(h1, action) @ W2 + b2, ReLU  (split matmul)
    h2 = (jnp.dot(h1.astype(jnp.bfloat16), w2h_ref[...],
                  preferred_element_type=jnp.float32)
          + jnp.dot(a16, w2a_ref[...], preferred_element_type=jnp.float32)
          + b2_ref[...])
    h2 = jnp.maximum(h2, 0.0)                      # [TB, 384] f32; lanes 300: are 0

    # Layer 3: Linear(300, 1).  An N=1 MXU matmul wastes the array, so do it
    # on the VPU (multiply) + XLU (lane reduce), which sit idle otherwise.
    q = jnp.sum(h2 * w3_ref[...], axis=-1, keepdims=True) + b3_ref[...]
    out_ref[...] = q.astype(out_ref.dtype)


def critic_forward(state, action, params):
    # Mirror PyTorch behavior: promote 1-D inputs to a batch of one.
    if state.ndim == 1:
        state = state[None, :]
        action = action[None, :]
    state = state.astype(jnp.float32)
    action = action.astype(jnp.float32)

    B, S = state.shape
    A = action.shape[1]

    tb = _pick_batch_tile(B)
    Bp = _round_up(B, tb)
    if Bp != B:
        state = jnp.pad(state, ((0, Bp - B), (0, 0)))
        action = jnp.pad(action, ((0, Bp - B), (0, 0)))

    def row_spec(shape):    # tiled along the batch axis
        return pl.BlockSpec(shape, lambda i: (i, 0))

    def const_spec(shape):  # same block every step -> stays resident in VMEM
        return pl.BlockSpec(shape, lambda i: (0, 0))

    out = pl.pallas_call(
        critic_kernel,
        out_shape=jax.ShapeDtypeStruct((Bp, 1), jnp.float32),
        grid=(Bp // tb,),
        in_specs=[
            row_spec((tb, S)),                 # state tile
            row_spec((tb, A)),                 # action tile
            const_spec((S, HID1_PAD)),         # W1 (state rows)
            const_spec((A, HID1_PAD)),         # W1 (action rows)
            const_spec((1, HID1_PAD)),         # b1
            const_spec((HID1_PAD, HID2_PAD)),  # W2 (h1 rows)
            const_spec((A, HID2_PAD)),         # W2 (action rows)
            const_spec((1, HID2_PAD)),         # b2
            const_spec((1, HID2_PAD)),         # W3 as a row vector (VPU)
            const_spec((1, 1)),                # b3
        ],
        out_specs=row_spec((tb, 1)),
        compiler_params=pltpu.CompilerParams(
            dimension_semantics=("parallel",)),
    )(state, action,
      params["w1s"], params["w1a"], params["b1"],
      params["w2h"], params["w2a"], params["b2"],
      params["w3"], params["b3"])
    return out[:B]


def init_params(key, state_dim, action_dim, mxu_dtype=jnp.bfloat16):
    """nn.Linear-style U(-1/sqrt(fan_in), 1/sqrt(fan_in)) init.

    Returns (kernel_params, f32_params): padded/split/bf16 params for the
    Pallas kernel, plus the unpadded f32 params for the pure-JAX reference.
    """
    def linear(key, fan_in, fan_out):
        kw, kb = jax.random.split(key)
        bound = 1.0 / math.sqrt(fan_in)
        w = jax.random.uniform(kw, (fan_in, fan_out), jnp.float32, -bound, bound)
        b = jax.random.uniform(kb, (fan_out,), jnp.float32, -bound, bound)
        return w, b

    k1, k2, k3 = jax.random.split(key, 3)
    w1, b1 = linear(k1, state_dim + action_dim, HID1)   # (S+A, 400)
    w2, b2 = linear(k2, HID1 + action_dim, HID2)        # (400+A, 300)
    w3, b3 = linear(k3, HID2, 1)                        # (300, 1)

    f32 = {"w1": w1, "b1": b1, "w2": w2, "b2": b2, "w3": w3, "b3": b3}

    S = state_dim
    p1 = HID1_PAD - HID1
    p2 = HID2_PAD - HID2

    kernel_params = {
        "w1s": jnp.pad(w1[:S], ((0, 0), (0, p1))).astype(mxu_dtype),      # (S, 512)
        "w1a": jnp.pad(w1[S:], ((0, 0), (0, p1))).astype(mxu_dtype),      # (A, 512)
        "b1":  jnp.pad(b1, (0, p1))[None, :],                             # (1, 512)
        "w2h": jnp.pad(w2[:HID1], ((0, p1), (0, p2))).astype(mxu_dtype),  # (512, 384)
        "w2a": jnp.pad(w2[HID1:], ((0, 0), (0, p2))).astype(mxu_dtype),   # (A, 384)
        "b2":  jnp.pad(b2, (0, p2))[None, :],                             # (1, 384)
        "w3":  jnp.pad(w3[:, 0], (0, p2))[None, :],                       # (1, 384) f32
        "b3":  b3[None, :],                                               # (1, 1)
    }
    return kernel_params, f32


def critic_reference(state, action, p):
    """Pure-JAX f32 reference matching the PyTorch module."""
    if state.ndim == 1:
        state = state[None, :]
        action = action[None, :]
    x = jnp.concatenate([state, action], axis=1)
    h1 = jax.nn.relu(x @ p["w1"] + p["b1"])
    h2 = jax.nn.relu(jnp.concatenate([h1, action], axis=1) @ p["w2"] + p["b2"])
    return h2 @ p["w3"] + p["b3"]


if __name__ == "__main__":
    key = jax.random.PRNGKey(0)
    k_param, k_state, k_action = jax.random.split(key, 3)

    batch = 2
    state_dim = 16
    action_dim = 4

    kparams, fparams = init_params(k_param, state_dim, action_dim)
    state = jax.random.normal(k_state, (batch, state_dim), jnp.float32)
    action = jax.random.normal(k_action, (batch, action_dim), jnp.float32)

    q = jax.block_until_ready(critic_forward(state, action, kparams))
    q_ref = critic_reference(state, action, fparams)

    assert q.shape == (batch, 1)
    # bf16 MXU operands with f32 accumulation vs. full-f32 reference.
    assert jnp.allclose(q, q_ref, atol=5e-2, rtol=5e-2), (q, q_ref)

    # 1-D input path (PyTorch unsqueeze behavior).
    q1 = jax.block_until_ready(critic_forward(state[0], action[0], kparams))
    assert q1.shape == (1, 1)
    assert jnp.allclose(q1, q[:1], atol=1e-4, rtol=1e-4)

    print("KERNEL_OK")
</pallas_src>

<mosaic_0001>
module attributes {stable_mosaic.version = 11 : i64} {
  func.func @critic_kernel(%arg0: i32, %arg1: memref<8x16xf32, #tpu.memory_space<vmem>>, %arg2: memref<8x4xf32, #tpu.memory_space<vmem>>, %arg3: memref<16x512xbf16, #tpu.memory_space<vmem>>, %arg4: memref<4x512xbf16, #tpu.memory_space<vmem>>, %arg5: memref<1x512xf32, #tpu.memory_space<vmem>>, %arg6: memref<512x384xbf16, #tpu.memory_space<vmem>>, %arg7: memref<4x384xbf16, #tpu.memory_space<vmem>>, %arg8: memref<1x384xf32, #tpu.memory_space<vmem>>, %arg9: memref<1x384xf32, #tpu.memory_space<vmem>>, %arg10: memref<1x1xf32, #tpu.memory_space<vmem>>, %arg11: memref<8x1xf32, #tpu.memory_space<vmem>>) attributes {dimension_semantics = [#tpu.dimension_semantics<parallel>], iteration_bounds = array<i64: 1>, scalar_prefetch = 0 : i64, scratch_operands = 0 : i64, tpu.core_type = #tpu.core_type<tc>, window_params = [{transform_indices = @transform_0, window_bounds = array<i64: 8, 16>}, {transform_indices = @transform_1, window_bounds = array<i64: 8, 4>}, {pipeline_mode = #tpu.pipeline_mode<synchronous>, transform_indices = @transform_2, window_bounds = array<i64: 16, 512>}, {pipeline_mode = #tpu.pipeline_mode<synchronous>, transform_indices = @transform_3, window_bounds = array<i64: 4, 512>}, {pipeline_mode = #tpu.pipeline_mode<synchronous>, transform_indices = @transform_4, window_bounds = array<i64: 1, 512>}, {pipeline_mode = #tpu.pipeline_mode<synchronous>, transform_indices = @transform_5, window_bounds = array<i64: 512, 384>}, {pipeline_mode = #tpu.pipeline_mode<synchronous>, transform_indices = @transform_6, window_bounds = array<i64: 4, 384>}, {pipeline_mode = #tpu.pipeline_mode<synchronous>, transform_indices = @transform_7, window_bounds = array<i64: 1, 384>}, {pipeline_mode = #tpu.pipeline_mode<synchronous>, transform_indices = @transform_8, window_bounds = array<i64: 1, 384>}, {pipeline_mode = #tpu.pipeline_mode<synchronous>, transform_indices = @transform_9, window_bounds = array<i64: 1, 1>}, {transform_indices = @transform_10, window_bounds = array<i64: 8, 1>}]} {
    %c0 = arith.constant 0 : index
    %c0_0 = arith.constant 0 : index
    %0 = vector.load %arg1[%c0, %c0_0] : memref<8x16xf32, #tpu.memory_space<vmem>>, vector<8x16xf32>
    %1 = arith.truncf %0 : vector<8x16xf32> to vector<8x16xbf16>
    %c0_1 = arith.constant 0 : index
    %c0_2 = arith.constant 0 : index
    %2 = vector.load %arg2[%c0_1, %c0_2] : memref<8x4xf32, #tpu.memory_space<vmem>>, vector<8x4xf32>
    %3 = arith.truncf %2 : vector<8x4xf32> to vector<8x4xbf16>
    %c0_3 = arith.constant 0 : index
    %c0_4 = arith.constant 0 : index
    %4 = vector.load %arg3[%c0_3, %c0_4] : memref<16x512xbf16, #tpu.memory_space<vmem>>, vector<16x512xbf16>
    %cst = arith.constant dense<0.000000e+00> : vector<8x512xf32>
    %5 = tpu.matmul %1, %4, %cst {dimension_numbers = #tpu.dot_dimension_numbers<[1], [0], [0], [1], [0, 0, 1, 1], [], []>} : vector<8x16xbf16>, vector<16x512xbf16>, vector<8x512xf32> -> vector<8x512xf32>
    %c0_5 = arith.constant 0 : index
    %c0_6 = arith.constant 0 : index
    %6 = vector.load %arg4[%c0_5, %c0_6] : memref<4x512xbf16, #tpu.memory_space<vmem>>, vector<4x512xbf16>
    %cst_7 = arith.constant dense<0.000000e+00> : vector<8x512xf32>
    %7 = tpu.matmul %3, %6, %cst_7 {dimension_numbers = #tpu.dot_dimension_numbers<[1], [0], [0], [1], [0, 0, 1, 1], [], []>} : vector<8x4xbf16>, vector<4x512xbf16>, vector<8x512xf32> -> vector<8x512xf32>
    %8 = arith.addf %5, %7 : vector<8x512xf32>
    %c0_8 = arith.constant 0 : index
    %c0_9 = arith.constant 0 : index
    %9 = vector.load %arg5[%c0_8, %c0_9] : memref<1x512xf32, #tpu.memory_space<vmem>>, vector<1x512xf32>
    %10 = vector.broadcast %9 : vector<1x512xf32> to vector<8x512xf32>
    %11 = arith.addf %8, %10 : vector<8x512xf32>
    %cst_10 = arith.constant 0.000000e+00 : f32
    %12 = vector.broadcast %cst_10 : f32 to vector<8x512xf32>
    %13 = arith.maximumf %11, %12 : vector<8x512xf32>
    %14 = arith.truncf %13 : vector<8x512xf32> to vector<8x512xbf16>
    %c0_11 = arith.constant 0 : index
    %c0_12 = arith.constant 0 : index
    %15 = vector.load %arg6[%c0_11, %c0_12] : memref<512x384xbf16, #tpu.memory_space<vmem>>, vector<512x384xbf16>
    %cst_13 = arith.constant dense<0.000000e+00> : vector<8x384xf32>
    %16 = tpu.matmul %14, %15, %cst_13 {dimension_numbers = #tpu.dot_dimension_numbers<[1], [0], [0], [1], [0, 0, 1, 1], [], []>} : vector<8x512xbf16>, vector<512x384xbf16>, vector<8x384xf32> -> vector<8x384xf32>
    %c0_14 = arith.constant 0 : index
    %c0_15 = arith.constant 0 : index
    %17 = vector.load %arg7[%c0_14, %c0_15] : memref<4x384xbf16, #tpu.memory_space<vmem>>, vector<4x384xbf16>
    %cst_16 = arith.constant dense<0.000000e+00> : vector<8x384xf32>
    %18 = tpu.matmul %3, %17, %cst_16 {dimension_numbers = #tpu.dot_dimension_numbers<[1], [0], [0], [1], [0, 0, 1, 1], [], []>} : vector<8x4xbf16>, vector<4x384xbf16>, vector<8x384xf32> -> vector<8x384xf32>
    %19 = arith.addf %16, %18 : vector<8x384xf32>
    %c0_17 = arith.constant 0 : index
    %c0_18 = arith.constant 0 : index
    %20 = vector.load %arg8[%c0_17, %c0_18] : memref<1x384xf32, #tpu.memory_space<vmem>>, vector<1x384xf32>
    %21 = vector.broadcast %20 : vector<1x384xf32> to vector<8x384xf32>
    %22 = arith.addf %19, %21 : vector<8x384xf32>
    %cst_19 = arith.constant 0.000000e+00 : f32
    %23 = vector.broadcast %cst_19 : f32 to vector<8x384xf32>
    %24 = arith.maximumf %22, %23 : vector<8x384xf32>
    %c0_20 = arith.constant 0 : index
    %c0_21 = arith.constant 0 : index
    %25 = vector.load %arg9[%c0_20, %c0_21] : memref<1x384xf32, #tpu.memory_space<vmem>>, vector<1x384xf32>
    %26 = vector.broadcast %25 : vector<1x384xf32> to vector<8x384xf32>
    %27 = arith.mulf %24, %26 : vector<8x384xf32>
    %cst_22 = arith.constant dense<0.000000e+00> : vector<8xf32>
    %28 = vector.multi_reduction <add>, %27, %cst_22 [1] : vector<8x384xf32> to vector<8xf32>
    %29 = vector.shape_cast %28 : vector<8xf32> to vector<8x1xf32>
    %c0_23 = arith.constant 0 : index
    %c0_24 = arith.constant 0 : index
    %30 = vector.load %arg10[%c0_23, %c0_24] : memref<1x1xf32, #tpu.memory_space<vmem>>, vector<1x1xf32>
    %31 = vector.broadcast %30 : vector<1x1xf32> to vector<8x1xf32>
    %32 = arith.addf %29, %31 : vector<8x1xf32>
    %c0_25 = arith.constant 0 : index
    %c0_26 = arith.constant 0 : index
    %33 = vector.load %arg11[%c0_25, %c0_26] : memref<8x1xf32, #tpu.memory_space<vmem>>, vector<8x1xf32>
    tpu.vector_store %arg11[%c0_25, %c0_26], %32 {strides = array<i32>} : memref<8x1xf32, #tpu.memory_space<vmem>>, vector<8x1xf32>,
    return
  }
  func.func @transform_0(%arg0: i32) -> (i32, i32) {
    %c0_i32 = arith.constant 0 : i32
    %c0_i32_0 = arith.constant 0 : i32
    return %arg0, %c0_i32 : i32, i32
  }
  func.func @transform_1(%arg0: i32) -> (i32, i32) {
    %c0_i32 = arith.constant 0 : i32
    %c0_i32_0 = arith.constant 0 : i32
    return %arg0, %c0_i32 : i32, i32
  }
  func.func @transform_2(%arg0: i32) -> (i32, i32) {
    %c0_i32 = arith.constant 0 : i32
    %c0_i32_0 = arith.constant 0 : i32
    %c0_i32_1 = arith.constant 0 : i32
    return %c0_i32, %c0_i32_0 : i32, i32
  }
  func.func @transform_3(%arg0: i32) -> (i32, i32) {
    %c0_i32 = arith.constant 0 : i32
    %c0_i32_0 = arith.constant 0 : i32
    %c0_i32_1 = arith.constant 0 : i32
    return %c0_i32, %c0_i32_0 : i32, i32
  }
  func.func @transform_4(%arg0: i32) -> (i32, i32) {
    %c0_i32 = arith.constant 0 : i32
    %c0_i32_0 = arith.constant 0 : i32
    %c0_i32_1 = arith.constant 0 : i32
    return %c0_i32, %c0_i32_0 : i32, i32
  }
  func.func @transform_5(%arg0: i32) -> (i32, i32) {
    %c0_i32 = arith.constant 0 : i32
    %c0_i32_0 = arith.constant 0 : i32
    %c0_i32_1 = arith.constant 0 : i32
    return %c0_i32, %c0_i32_0 : i32, i32
  }
  func.func @transform_6(%arg0: i32) -> (i32, i32) {
    %c0_i32 = arith.constant 0 : i32
    %c0_i32_0 = arith.constant 0 : i32
    %c0_i32_1 = arith.constant 0 : i32
    return %c0_i32, %c0_i32_0 : i32, i32
  }
  func.func @transform_7(%arg0: i32) -> (i32, i32) {
    %c0_i32 = arith.constant 0 : i32
    %c0_i32_0 = arith.constant 0 : i32
    %c0_i32_1 = arith.constant 0 : i32
    return %c0_i32, %c0_i32_0 : i32, i32
  }
  func.func @transform_8(%arg0: i32) -> (i32, i32) {
    %c0_i32 = arith.constant 0 : i32
    %c0_i32_0 = arith.constant 0 : i32
    %c0_i32_1 = arith.constant 0 : i32
    return %c0_i32, %c0_i32_0 : i32, i32
  }
  func.func @transform_9(%arg0: i32) -> (i32, i32) {
    %c0_i32 = arith.constant 0 : i32
    %c0_i32_0 = arith.constant 0 : i32
    %c0_i32_1 = arith.constant 0 : i32
    return %c0_i32, %c0_i32_0 : i32, i32
  }
  func.func @transform_10(%arg0: i32) -> (i32, i32) {
    %c0_i32 = arith.constant 0 : i32
    %c0_i32_0 = arith.constant 0 : i32
    return %arg0, %c0_i32 : i32, i32
  }
}

</mosaic_0001>

<bundles_post_ra>
// kernel: tpu_custom_call.1
= control target key start
LH: loop header
LB: loop body
LE: loop exit
PB: predicated region body
PF: predicated region fallthrough
CT: control target
= control target key end

     0   :  { %s1827_s0 = inlined_call_operand.vmem [shape: f32[8,16], index: 0, kind: input, shape index: {}]   ;;  %s1828_s1 = inlined_call_operand.vmem [shape: f32[8,4], index: 1, kind: input, shape index: {}]   ;;  %s1829_s2 = inlined_call_operand.hbm [shape: bf16[16,512], index: 2, kind: input, shape index: {}]   ;;  %s1830_s3 = inlined_call_operand.vmem [shape: bf16[4,512], index: 3, kind: input, shape index: {}]   ;;  %s1831_s4 = inlined_call_operand.vmem [shape: f32[1,512], index: 4, kind: input, shape index: {}]   ;;  %s1832_s5 = inlined_call_operand.hbm [shape: bf16[512,384], index: 5, kind: input, shape index: {}]   ;;  %s1833_s6 = inlined_call_operand.vmem [shape: bf16[4,384], index: 6, kind: input, shape index: {}]   ;;  %s1834_s7 = inlined_call_operand.vmem [shape: f32[1,384], index: 7, kind: input, shape index: {}]   ;;  %s1835_s8 = inlined_call_operand.vmem [shape: f32[1,384], index: 8, kind: input, shape index: {}]   ;;  %s1836_s9 = inlined_call_operand.<no memory space> [shape: f32[1,1], index: 9, kind: input, shape index: {}]   ;;  %s1837_s10 = inlined_call_operand.vmem [shape: f32[8,1], index: 10, kind: output, shape index: {}]  }
   0x1   :  { %v15_v0 = vstv %s1836_s9 }
   0x2   :  { %16 = vst [vmem:[#allocation2] sm:$0x1] %v15_v0 }
   0x3   :  { %17 = vsyncpa [#allocation4], 0 }
   0x4   :  { %18 = vsyncpa [#allocation6], 0  ;;  %s1661_s15 = smov [#allocation3]   ;;  %s1613_s19 = scalar_lea.hbm %s1829_s2, 512 }
   0x5   :  { %s28_s16 = sshll.u32 %s1661_s15, 4  ;;  %p1614_p0 = scmp.ne.s32.totalorder %s1829_s2, %s1613_s19  ;;  %s29_s16 = int_to_ptr.vmem [resolvable:$true] %s28_s16 }
   0x6   :  { %p1617_p1 = scmp.lt.u32.totalorder %s1613_s19, %s1829_s2 }
   0x8   :  { %p1619_p2 = pnand %p1617_p1, %p1614_p0 }
   0xa   :  { %1622 = shalt.err (!%p1619_p2)
}
   0xb   :  { %s1623_s9 = scalar_lea.vmem %s29_s16, 512  ;;  %p1628_p4 = scmp.lt.s32.totalorder %s29_s16, %s29_s16 }
   0xc   :  { %p1624_p3 = scmp.ne.s32.totalorder %s29_s16, %s1623_s9  ;;  %p1629_p5 = scmp.lt.s32.totalorder %s1623_s9, %s1623_s9 }
   0xe   :  { %p1630_p6 = por %p1629_p5, %p1628_p4 }
  0x10   :  { %p1631_p7 = pnand %p1630_p6, %p1624_p3 }
  0x12   :  { %1634 = shalt.err (!%p1631_p7)
}
  0x13   :  { %s1662_s24 = smov 256   ;;  %s1663_s25 = smov 16  }
  0x14   :  { %34 = dma.hbm_to_vmem [thread:$0]  %s1829_s2, 512, %s29_s16, [#allocation4], %s1662_s24, %s1662_s24, %s1663_s25  }
  0x15   :  { %s1664_s28 = smov [#allocation5]   ;;  %s1635_s12 = scalar_lea.hbm %s1832_s5, 12288 }
  0x16   :  { %s44_s29 = sshll.u32 %s1664_s28, 4  ;;  %p1636_p8 = scmp.ne.s32.totalorder %s1832_s5, %s1635_s12  ;;  %s45_s29 = int_to_ptr.vmem [resolvable:$true] %s44_s29 }
  0x17   :  { %p1639_p9 = scmp.lt.u32.totalorder %s1635_s12, %s1832_s5 }
  0x19   :  { %p1641_p10 = pnand %p1639_p9, %p1636_p8 }
  0x1b   :  { %1644 = shalt.err (!%p1641_p10)
}
  0x1c   :  { %s1645_s18 = scalar_lea.vmem %s45_s29, 12288  ;;  %p1650_p12 = scmp.lt.s32.totalorder %s45_s29, %s45_s29 }
  0x1d   :  { %p1646_p11 = scmp.ne.s32.totalorder %s45_s29, %s1645_s18  ;;  %p1651_p13 = scmp.lt.s32.totalorder %s1645_s18, %s1645_s18 }
  0x1f   :  { %p1652_p0 = por %p1651_p13, %p1650_p12 }
  0x21   :  { %p1653_p1 = pnand %p1652_p0, %p1646_p11 }
  0x23   :  { %1656 = shalt.err (!%p1653_p1)
}
  0x24   :  { %s1665_s2 = smov 192   ;;  %s1666_s16 = smov 12  }
  0x25   :  { %50 = dma.hbm_to_vmem [thread:$0]  %s1832_s5, 12288, %s45_s29, [#allocation6], %s1665_s2, %s1665_s2, %s1666_s16  }
  0x26   :  { %1657 = dma.done.wait [#allocation4], 512  }
  0x27   :  { %1658 = vsyncadd [#allocation4], 4294966784 }
  0x28   :  { %1659 = dma.done.wait [#allocation6], 12288  }
  0x29   :  { %1660 = vsyncadd [#allocation6], 4294955008  ;;  %v80_v1 = vlaneseq  ;;  %v1667_v2 = vmov 1983009808   ;;  %v1668_v4 = vmov 0   ;;  %v74_v8 = vld [vmem:[%s1830_s3] sm:$0xff] }
  0x2a   :  { %v78_v3 = vunpack.c.l.s4 %v1667_v2  ;;  %142 = vmatprep.mubr.bf16.mxu0 %v1668_v4  ;;  %183 = vmatprep.mubr.bf16.mxu1 %v1668_v4  ;;  %vm97_vm0 = vcmask 1041408   ;;  %v76_v10 = vcombine.high %v74_v8, %v74_v8  ;;  %v68_v11 = vld [vmem:[%s1828_s1] sm:$0xff]  ;;  %vm93_vm1 = vcmask 31744   ;;  %v1481_v24 = vld [vmem:[#allocation3 + $0x8] ss:$16 sps:$4 sm:$0xff]  }
  0x2b   :  { %v1753_v5 = vshrl.u32 %v80_v1, 7  ;;  %v1480_v15 = vld [vmem:[#allocation3 + $0x4] ss:$16 sps:$4 sm:$0xff]   ;;  %v69_v20 = vpack.c.bf16 %v68_v11, %v68_v11  ;;  %v1483_v21 = vld [vmem:[#allocation3 + $0xc] ss:$16 sps:$4 sm:$0xff]   ;;  %v1669_v28 = vmov 0.0  }
  0x2c   :  { %v79_v6 = vunpack.c.0.s8 %v78_v3  ;;  %v460_v16 = vld [vmem:[%s1833_s6] sm:$0x3f]  ;;  %vm212_vm2 = vcmask 130048   ;;  %vm1670_vm3 = vmmov 0   ;;  %v1505_v44 = vld [vmem:[#allocation5 + $0x4c] ss:$12 sps:$4 sm:$0xff]  }
  0x2d   :  { %v1478_v22 = vld [vmem:[#allocation3] ss:$16 sps:$4 sm:$0xff]   ;;  %v462_v25 = vcombine.high %v460_v16, %v460_v16  ;;  %v1493_v35 = vld [vmem:[#allocation5 + $0x1c] ss:$12 sps:$4 sm:$0xff]   ;;  %v1491_v38 = vld [vmem:[#allocation5 + $0x18] ss:$12 sps:$4 sm:$0xff]  }
  0x2e   :  { %v82_v7 = vsub.s32 %v79_v6, %v1753_v5  ;;  %v66_v26 = vld [vmem:[%s1827_s0] sm:$0xff]  ;;  %v1503_v45 = vld [vmem:[#allocation5 + $0x48] ss:$12 sps:$4 sm:$0xff]   ;;  %v1508_v46 = vld [vmem:[#allocation5 + $0x1cc] ss:$12 sps:$4 sm:$0xff]   ;;  %vm1297_vm4 = vcmask 7168  }
  0x2f   :  { %v67_v27 = vpack.c.bf16 %v66_v26, %v66_v26  ;;  %v1487_v31 = vld [vmem:[#allocation5 + $0x4] ss:$12 sps:$4 sm:$0xff]   ;;  %v1485_v34 = vld [vmem:[#allocation5] ss:$12 sps:$4 sm:$0xff]   ;;  %v1496_v37 = vld [vmem:[#allocation5 + $0x19c] ss:$12 sps:$4 sm:$0xff]  }
  0x30   :  { %v83_v9 = vrot.slane %v74_v8, %v82_v7  ;;  %v90_v14 = vrot.slane %v76_v10, %v82_v7  ;;  %v469_v17 = vrot.slane %v460_v16, %v82_v7  ;;  %v476_v29 = vrot.slane %v462_v25, %v82_v7  ;;  %v1490_v33 = vld [vmem:[#allocation5 + $0x184] ss:$12 sps:$4 sm:$0xff]   ;;  %v1488_v36 = vld [vmem:[#allocation5 + $0x180] ss:$12 sps:$4 sm:$0xff]   ;;  %v1506_v47 = vld [vmem:[#allocation5 + $0x1c8] ss:$12 sps:$4 sm:$0xff]  }
  0x31   :  { %v1499_v39 = vld [vmem:[#allocation5 + $0x34] ss:$12 sps:$4 sm:$0xff]   ;;  %v1494_v40 = vld [vmem:[#allocation5 + $0x198] ss:$12 sps:$4 sm:$0xff]   ;;  %v1497_v42 = vld [vmem:[#allocation5 + $0x30] ss:$12 sps:$4 sm:$0xff]  }
  0x32   :  { %v91_v12 = vcombine.high %v83_v9, %v83_v9  ;;  %v99_v13 = vsel %vm97_vm0, %v83_v9, 0  ;;  %v92_v18 = vcombine.high %v90_v14, %v90_v14  ;;  %v105_v19 = vsel %vm97_vm0, %v90_v14, 0  ;;  %v1502_v41 = vld [vmem:[#allocation5 + $0x1b4] ss:$12 sps:$4 sm:$0xff]   ;;  %v1500_v43 = vld [vmem:[#allocation5 + $0x1b0] ss:$12 sps:$4 sm:$0xff]  }
  0x33   :  { %v477_v23 = vcombine.high %v469_v17, %v469_v17  ;;  %v479_v30 = vsel %vm97_vm0, %v469_v17, 0  ;;  %v485_v32 = vsel %vm97_vm0, %v476_v29, 0  ;;  %v1511_v48 = vld [vmem:[#allocation5 + $0x64] ss:$12 sps:$4 sm:$0xff]   ;;  %v1509_v50 = vld [vmem:[#allocation5 + $0x60] ss:$12 sps:$4 sm:$0xff]  }
  0x34   :  { %1305 = vmatprep.subr.msk.bf16.mxu0 %vm97_vm0, %v91_v12  ;;  %1307 = vmatprep.subr.msk.bf16.mxu1 %vm97_vm0, %v92_v18  ;;  %v1514_v49 = vld [vmem:[#allocation5 + $0x1e4] ss:$12 sps:$4 sm:$0xff]   ;;  %v1517_v51 = vld [vmem:[#allocation5 + $0x7c] ss:$12 sps:$4 sm:$0xff]   ;;  %v1512_v52 = vld [vmem:[#allocation5 + $0x1e0] ss:$12 sps:$4 sm:$0xff]  }
  0x35   :  { %111 = vmatpush1.bf16.msra.mxu0 %v99_v13  ;;  %152 = vmatpush1.bf16.msra.mxu1 %v105_v19  ;;  %v1520_v53 = vld [vmem:[#allocation5 + $0x1fc] ss:$12 sps:$4 sm:$0xff]   ;;  %v1515_v54 = vld [vmem:[#allocation5 + $0x78] ss:$12 sps:$4 sm:$0xff]   ;;  %v1523_v55 = vld [vmem:[#allocation5 + $0x94] ss:$12 sps:$4 sm:$0xff]  }
  0x36   :  { %216 = vmatprep.subr.bf16.mxu0 %v1480_v15  ;;  %257 = vmatprep.subr.bf16.mxu1 %v1483_v21  ;;  %v1518_v56 = vld [vmem:[#allocation5 + $0x1f8] ss:$12 sps:$4 sm:$0xff]   ;;  %v1526_v57 = vld [vmem:[#allocation5 + $0x214] ss:$12 sps:$4 sm:$0xff]   ;;  %v1521_v58 = vld [vmem:[#allocation5 + $0x90] ss:$12 sps:$4 sm:$0xff]  }
  0x37   :  { %v1529_v59 = vld [vmem:[#allocation5 + $0xac] ss:$12 sps:$4 sm:$0xff]   ;;  %v1524_v60 = vld [vmem:[#allocation5 + $0x210] ss:$12 sps:$4 sm:$0xff]   ;;  %v1527_v62 = vld [vmem:[#allocation5 + $0xa8] ss:$12 sps:$4 sm:$0xff]  }
  0x38   :  { %1306 = vmatmul.mubr.msk.bf16.vlgmr.msra.gmra.mrb[0].mxu0 %vm93_vm1, %v69_v20  ;;  %1308 = vmatmul.mubr.msk.bf16.vlgmr.msra.gmra.mrb[0].mxu1 %vm93_vm1, %v69_v20  ;;  %v1532_v61 = vld [vmem:[#allocation5 + $0x22c] ss:$12 sps:$4 sm:$0xff]   ;;  %v1535_v63 = vld [vmem:[#allocation5 + $0xc4] ss:$12 sps:$4 sm:$0xff]   ;;  %v1530_v0 = vld [vmem:[#allocation5 + $0x228] ss:$12 sps:$4 sm:$0xff]  }
  0x39   :  { %217 = vmatpush1.bf16.msra.mxu0 %v1478_v22  ;;  %248 = vmatprep.mubr.bf16.mxu0 %v1668_v4  ;;  %v1538_v1 = vld [vmem:[#allocation5 + $0x244] ss:$12 sps:$4 sm:$0xff]   ;;  %v1533_v2 = vld [vmem:[#allocation5 + $0xc0] ss:$12 sps:$4 sm:$0xff]   ;;  %v1541_v3 = vld [vmem:[#allocation5 + $0xdc] ss:$12 sps:$4 sm:$0xff]  }
  0x3a   :  { %1315 = vmatprep.subr.msk.bf16.mxu0 %vm97_vm0, %v477_v23  ;;  %258 = vmatpush1.bf16.msra.mxu1 %v1481_v24  ;;  %v1544_v6 = vld [vmem:[#allocation5 + $0x25c] ss:$12 sps:$4 sm:$0xff]   ;;  %v1539_v7 = vld [vmem:[#allocation5 + $0xd8] ss:$12 sps:$4 sm:$0xff]   ;;  %v1547_v8 = vld [vmem:[#allocation5 + $0xf4] ss:$12 sps:$4 sm:$0xff]  }
  0x3b   :  { %289 = vmatprep.mubr.bf16.mxu1 %v1668_v4  ;;  %1461 = vmatprep.subr.bf16.mxu1 %v1669_v28  ;;  %v1542_v9 = vld [vmem:[#allocation5 + $0x258] ss:$12 sps:$4 sm:$0xff]   ;;  %v1550_v10 = vld [vmem:[#allocation5 + $0x274] ss:$12 sps:$4 sm:$0xff]   ;;  %v1545_v11 = vld [vmem:[#allocation5 + $0xf0] ss:$12 sps:$4 sm:$0xff]  }
  0x3c   :  { %v1553_v12 = vld [vmem:[#allocation5 + $0x10c] ss:$12 sps:$4 sm:$0xff]   ;;  %v1548_v13 = vld [vmem:[#allocation5 + $0x270] ss:$12 sps:$4 sm:$0xff]   ;;  %v1551_v14 = vld [vmem:[#allocation5 + $0x108] ss:$12 sps:$4 sm:$0xff]  }
  0x3d   :  { %v1556_v15 = vld [vmem:[#allocation5 + $0x28c] ss:$12 sps:$4 sm:$0xff]   ;;  %v1554_v16 = vld [vmem:[#allocation5 + $0x288] ss:$12 sps:$4 sm:$0xff]   ;;  %v1559_v17 = vld [vmem:[#allocation5 + $0x124] ss:$12 sps:$4 sm:$0xff]  }
  0x3e   :  { %v1557_v18 = vld [vmem:[#allocation5 + $0x120] ss:$12 sps:$4 sm:$0xff]   ;;  %v1562_v19 = vld [vmem:[#allocation5 + $0x2a4] ss:$12 sps:$4 sm:$0xff]   ;;  %v1565_v21 = vld [vmem:[#allocation5 + $0x13c] ss:$12 sps:$4 sm:$0xff]  }
  0x3f   :  { %v1563_v22 = vld [vmem:[#allocation5 + $0x138] ss:$12 sps:$4 sm:$0xff]   ;;  %v1568_v23 = vld [vmem:[#allocation5 + $0x2bc] ss:$12 sps:$4 sm:$0xff]   ;;  %v1571_v25 = vld [vmem:[#allocation5 + $0x154] ss:$12 sps:$4 sm:$0xff]  }
  0x40   :  { %1313 = vmatmul.mubr.msk.bf16.vlgmr.msra.gmra.mrb[4].mxu0 %vm212_vm2, %v67_v27  ;;  %1314 = vmatmul.mubr.msk.bf16.vlgmr.msra.gmra.mrb[4].mxu1 %vm212_vm2, %v67_v27  ;;  %v1566_v24 = vld [vmem:[#allocation5 + $0x2b8] ss:$12 sps:$4 sm:$0xff]   ;;  %v1569_v26 = vld [vmem:[#allocation5 + $0x150] ss:$12 sps:$4 sm:$0xff]   ;;  %v1574_v27 = vld [vmem:[#allocation5 + $0x2d4] ss:$12 sps:$4 sm:$0xff]  }
  0x41   :  { %488 = vmatpush1.bf16.msra.mxu0 %v479_v30  ;;  %519 = vmatprep.mubr.bf16.mxu0 %v1668_v4  ;;  %v1536_v4 = vld [vmem:[#allocation5 + $0x240] ss:$12 sps:$4 sm:$0xff]   ;;  %v1575_v30 = vld [vmem:[#allocation5 + $0x168] ss:$12 sps:$4 sm:$0xff]  }
  0x42   :  { %1080 = vmatprep.subr.bf16.mxu0 %v1487_v31  ;;  %1462 = vmatpush3.bf16.msra.mxu1 %v485_v32  ;;  %v1577_v29 = vld [vmem:[#allocation5 + $0x16c] ss:$12 sps:$4 sm:$0xff]   ;;  %v1578_v32 = vld [vmem:[#allocation5 + $0x2e8] ss:$12 sps:$4 sm:$0xff]  }
  0x43   :  { %1463 = vmatprep.mubr.msk.bf16.mxu1 %vm1670_vm3, %v1669_v28  ;;  %1121 = vmatprep.subr.bf16.mxu1 %v1490_v33  ;;  %v1572_v28 = vld [vmem:[#allocation5 + $0x2d0] ss:$12 sps:$4 sm:$0xff]   ;;  %v1580_v31 = vld [vmem:[#allocation5 + $0x2ec] ss:$12 sps:$4 sm:$0xff]   ;;  %v1581_v33 = vld [vmem:[#allocation5 + $0xc8] ss:$12 sps:$4 sm:$0xff]  }
  0x48   :  { %1316 = vmatmul.mubr.msk.bf16.vlgmr.msra.gmra.mrb[8].mxu0 %vm93_vm1, %v69_v20  ;;  %1464 = vmatmul.mubr.msk.bf16.vlgmr.msra.gmra.mrb[8].mxu1 %vm93_vm1, %v69_v20  ;;  %v1560_v20 = vld [vmem:[#allocation5 + $0x2a0] ss:$12 sps:$4 sm:$0xff]  }
  0x49   :  { %1081 = vmatpush1.bf16.msra.mxu0 %v1485_v34  ;;  %1122 = vmatpush1.bf16.msra.mxu1 %v1488_v36  ;;  %v1583_v34 = vld [vmem:[#allocation5 + $0x248] ss:$12 sps:$4 sm:$0xff]  }
  0x4a   :  { %1082 = vmatprep.subr.bf16.mxu0 %v1493_v35  ;;  %1123 = vmatprep.subr.bf16.mxu1 %v1496_v37 }
  0x4d   :  { %1083 = vmatpush1.bf16.msra.mxu0 %v1491_v38  ;;  %1124 = vmatpush1.bf16.msra.mxu1 %v1494_v40 }
  0x4e   :  { %1084 = vmatprep.subr.bf16.mxu0 %v1499_v39  ;;  %1125 = vmatprep.subr.bf16.mxu1 %v1502_v41  ;;  %v1780_v41 = vsub.s32 0, %v1753_v5 }
  0x51   :  { %1085 = vmatpush1.bf16.msra.mxu0 %v1497_v42  ;;  %1126 = vmatpush1.bf16.msra.mxu1 %v1500_v43  ;;  %v298_v43 = vld [vmem:[%s1831_s4] sm:$0xf] }
  0x52   :  { %1086 = vmatprep.subr.bf16.mxu0 %v1505_v44  ;;  %1127 = vmatprep.subr.bf16.mxu1 %v1508_v46  ;;  %v1786_v44 = vsub.s32 1, %v1753_v5  ;;  %v1789_v46 = vsub.s32 2, %v1753_v5 }
  0x55   :  { %1087 = vmatpush1.bf16.msra.mxu0 %v1503_v45  ;;  %1128 = vmatpush1.bf16.msra.mxu1 %v1506_v47  ;;  %v314_v47 = vsub.s32 3, %v1753_v5 }
  0x56   :  { %1088 = vmatprep.subr.bf16.mxu0 %v1511_v48  ;;  %1129 = vmatprep.subr.bf16.mxu1 %v1514_v49  ;;  %v303_v48 = vrot.slane %v298_v43, %v1780_v41 }
  0x59   :  { %1089 = vmatpush1.bf16.msra.mxu0 %v1509_v50  ;;  %1130 = vmatpush1.bf16.msra.mxu1 %v1512_v52  ;;  %v307_v50 = vrot.slane %v298_v43, %v1786_v44 }
  0x5a   :  { %1090 = vmatprep.subr.bf16.mxu0 %v1517_v51  ;;  %1131 = vmatprep.subr.bf16.mxu1 %v1520_v53  ;;  %v311_v53 = vrot.slane %v298_v43, %v1789_v46 }
  0x5d   :  { %1091 = vmatpush1.bf16.msra.mxu0 %v1515_v54  ;;  %1132 = vmatpush1.bf16.msra.mxu1 %v1518_v56 }
  0x5e   :  { %1092 = vmatprep.subr.bf16.mxu0 %v1523_v55  ;;  %1133 = vmatprep.subr.bf16.mxu1 %v1526_v57  ;;  %v315_v57 = vrot.slane %v298_v43, %v314_v47  ;;  %v1604_v43 = vld [vmem:[#allocation5 + $0x200] ss:$12 sps:$4 sm:$0xff]   ;;  %v1606_v47 = vld [vmem:[#allocation5 + $0x98] ss:$12 sps:$4 sm:$0xff]  }
  0x61   :  { %1093 = vmatpush1.bf16.msra.mxu0 %v1521_v58  ;;  %1134 = vmatpush1.bf16.msra.mxu1 %v1524_v60 }
  0x62   :  { %1094 = vmatprep.subr.bf16.mxu0 %v1529_v59  ;;  %1135 = vmatprep.subr.bf16.mxu1 %v1532_v61 }
  0x65   :  { %1095 = vmatpush1.bf16.msra.mxu0 %v1527_v62  ;;  %1136 = vmatpush1.bf16.msra.mxu1 %v1530_v0 }
  0x66   :  { %1096 = vmatprep.subr.bf16.mxu0 %v1535_v63  ;;  %1137 = vmatprep.subr.bf16.mxu1 %v1538_v1 }
  0x69   :  { %1097 = vmatpush1.bf16.msra.mxu0 %v1533_v2  ;;  %1138 = vmatpush1.bf16.msra.mxu1 %v1536_v4 }
  0x6a   :  { %1098 = vmatprep.subr.bf16.mxu0 %v1541_v3  ;;  %1139 = vmatprep.subr.bf16.mxu1 %v1544_v6 }
  0x6d   :  { %1099 = vmatpush1.bf16.msra.mxu0 %v1539_v7  ;;  %1140 = vmatpush1.bf16.msra.mxu1 %v1542_v9  ;;  %v1582_v9 = vld [vmem:[#allocation5 + $0x8] ss:$12 sps:$4 sm:$0xff]  }
  0x6e   :  { %1100 = vmatprep.subr.bf16.mxu0 %v1547_v8  ;;  %1141 = vmatprep.subr.bf16.mxu1 %v1550_v10 }
  0x71   :  { %1101 = vmatpush1.bf16.msra.mxu0 %v1545_v11  ;;  %1142 = vmatpush1.bf16.msra.mxu1 %v1548_v13 }
  0x72   :  { %1102 = vmatprep.subr.bf16.mxu0 %v1553_v12  ;;  %1143 = vmatprep.subr.bf16.mxu1 %v1556_v15  ;;  %v1585_v15 = vld [vmem:[#allocation5 + $0xe0] ss:$12 sps:$4 sm:$0xff]  }
  0x75   :  { %1103 = vmatpush1.bf16.msra.mxu0 %v1551_v14  ;;  %1144 = vmatpush1.bf16.msra.mxu1 %v1554_v16  ;;  %v1584_v14 = vld [vmem:[#allocation5 + $0x188] ss:$12 sps:$4 sm:$0xff]  }
  0x76   :  { %1104 = vmatprep.subr.bf16.mxu0 %v1559_v17  ;;  %1145 = vmatprep.subr.bf16.mxu1 %v1562_v19  ;;  %v1587_v19 = vld [vmem:[#allocation5 + $0x260] ss:$12 sps:$4 sm:$0xff]  }
  0x79   :  { %1105 = vmatpush1.bf16.msra.mxu0 %v1557_v18  ;;  %1146 = vmatpush1.bf16.msra.mxu1 %v1560_v20 }
  0x7a   :  { %1106 = vmatprep.subr.bf16.mxu0 %v1565_v21  ;;  %1147 = vmatprep.subr.bf16.mxu1 %v1568_v23 }
  0x7d   :  { %1107 = vmatpush1.bf16.msra.mxu0 %v1563_v22  ;;  %1148 = vmatpush1.bf16.msra.mxu1 %v1566_v24  ;;  %v1586_v22 = vld [vmem:[#allocation5 + $0x20] ss:$12 sps:$4 sm:$0xff]   ;;  %v1589_v24 = vld [vmem:[#allocation5 + $0xf8] ss:$12 sps:$4 sm:$0xff]  }
  0x7e   :  { %1108 = vmatprep.subr.bf16.mxu0 %v1571_v25  ;;  %1149 = vmatprep.subr.bf16.mxu1 %v1574_v27  ;;  %v1591_v27 = vld [vmem:[#allocation5 + $0x278] ss:$12 sps:$4 sm:$0xff]  }
  0x81   :  { %1109 = vmatpush1.bf16.msra.mxu0 %v1569_v26  ;;  %1150 = vmatpush1.bf16.msra.mxu1 %v1572_v28  ;;  %v1588_v26 = vld [vmem:[#allocation5 + $0x1a0] ss:$12 sps:$4 sm:$0xff]   ;;  %v1590_v28 = vld [vmem:[#allocation5 + $0x38] ss:$12 sps:$4 sm:$0xff]  }
  0x82   :  { %1110 = vmatprep.subr.bf16.mxu0 %v1577_v29  ;;  %1151 = vmatprep.subr.bf16.mxu1 %v1580_v31  ;;  %v1593_v29 = vld [vmem:[#allocation5 + $0x110] ss:$12 sps:$4 sm:$0xff]  }
  0x83   :  { %v1595_v31 = vld [vmem:[#allocation5 + $0x290] ss:$12 sps:$4 sm:$0xff]  }
  0x85   :  { %1111 = vmatpush1.bf16.msra.mxu0 %v1575_v30  ;;  %1152 = vmatpush1.bf16.msra.mxu1 %v1578_v32  ;;  %v1592_v30 = vld [vmem:[#allocation5 + $0x1b8] ss:$12 sps:$4 sm:$0xff]   ;;  %v1594_v32 = vld [vmem:[#allocation5 + $0x50] ss:$12 sps:$4 sm:$0xff]  }
  0x86   :  { %1417 = vmatprep.subr.bf16.mxu0 %v1581_v33  ;;  %1439 = vmatprep.subr.bf16.mxu1 %v1583_v34  ;;  %v1597_v33 = vld [vmem:[#allocation5 + $0x128] ss:$12 sps:$4 sm:$0xff]   ;;  %v1596_v34 = vld [vmem:[#allocation5 + $0x1d0] ss:$12 sps:$4 sm:$0xff]  }
 0x10b   :  { %v144_v35 = vpop.f32.mrb[0].mxu0  ;;  %v185_v38 = vpop.f32.mrb[0].mxu1 }
 0x10c   :  { %v146_v36 = vpop.f32.mrb[1].mxu0  ;;  %v187_v40 = vpop.f32.mrb[1].mxu1 }
 0x10d   :  { %v148_v37 = vpop.f32.mrb[2].mxu0  ;;  %v189_v42 = vpop.f32.mrb[2].mxu1 }
 0x10e   :  { %v149_v39 = vpop.f32.mrb[3].mxu0  ;;  %v190_v45 = vpop.f32.mrb[3].mxu1  ;;  %v1601_v37 = vld [vmem:[#allocation5 + $0x140] ss:$12 sps:$4 sm:$0xff]   ;;  %v1605_v42 = vld [vmem:[#allocation5 + $0x158] ss:$12 sps:$4 sm:$0xff]  }
 0x10f   :  { %v1603_v39 = vld [vmem:[#allocation5 + $0x2c0] ss:$12 sps:$4 sm:$0xff]   ;;  %v1607_v45 = vld [vmem:[#allocation5 + $0x2d8] ss:$12 sps:$4 sm:$0xff]  }
 0x113   :  { %v250_v49 = vpop.f32.mrb[4].mxu0  ;;  %v291_v56 = vpop.f32.mrb[4].mxu1 }
 0x114   :  { %v251_v51 = vadd.f32 %v250_v49, %v144_v35  ;;  %v252_v52 = vpop.f32.mrb[5].mxu0  ;;  %v292_v59 = vadd.f32 %v291_v56, %v185_v38  ;;  %v293_v61 = vpop.f32.mrb[5].mxu1  ;;  %v1599_v35 = vld [vmem:[#allocation5 + $0x2a8] ss:$12 sps:$4 sm:$0xff]   ;;  %v1608_v49 = vld [vmem:[#allocation5 + $0x218] ss:$12 sps:$4 sm:$0xff]  }
 0x115   :  { %v253_v54 = vadd.f32 %v252_v52, %v146_v36  ;;  %v254_v55 = vpop.f32.mrb[6].mxu0  ;;  %v294_v63 = vadd.f32 %v293_v61, %v187_v40  ;;  %v295_v5 = vpop.f32.mrb[6].mxu1  ;;  %v1598_v36 = vld [vmem:[#allocation5 + $0x68] ss:$12 sps:$4 sm:$0xff]   ;;  %v1602_v40 = vld [vmem:[#allocation5 + $0x80] ss:$12 sps:$4 sm:$0xff]  }
 0x116   :  { %v320_v58 = vadd.f32 %v303_v48, %v251_v51  ;;  %v255_v60 = vpop.f32.mrb[7].mxu0  ;;  %v322_v1 = vadd.f32 %v311_v53, %v292_v59  ;;  %v296_v2 = vpop.f32.mrb[7].mxu1  ;;  %v1600_v38 = vld [vmem:[#allocation5 + $0x1e8] ss:$12 sps:$4 sm:$0xff]   ;;  %v1609_v48 = vld [vmem:[#allocation5 + $0x170] ss:$12 sps:$4 sm:$0xff]  }
 0x117   :  { %v321_v62 = vadd.f32 %v307_v50, %v253_v54  ;;  %v323_v4 = vadd.f32 %v315_v57, %v294_v63  ;;  %v1611_v50 = vld [vmem:[#allocation5 + $0x2f0] ss:$12 sps:$4 sm:$0xff]  }
 0x118   :  { %v324_v0 = vmax.f32 %v320_v58, 0.0  ;;  %v326_v6 = vmax.f32 %v322_v1, 0.0  ;;  %v1610_v51 = vld [vmem:[#allocation5 + $0xb0] ss:$12 sps:$4 sm:$0xff]  }
 0x119   :  { %v325_v3 = vmax.f32 %v321_v62, 0.0  ;;  %v327_v8 = vmax.f32 %v323_v4, 0.0  ;;  %v1612_v52 = vld [vmem:[#allocation5 + $0x230] ss:$12 sps:$4 sm:$0xff]  }
 0x11a   :  { %v1797_v11 = vpack.c.bf16 %v324_v0, %v324_v0  ;;  %v1803_v18 = vpack.c.bf16 %v326_v6, %v326_v6  ;;  %v1242_v53 = vld [vmem:[%s1834_s7] sm:$0x7] }
 0x11b   :  { %v329_v7 = vpack.c.bf16 %v325_v3, %v325_v3  ;;  %v1795_v10 = vpop.f32.mrb[8].mxu0  ;;  %v331_v13 = vpack.c.bf16 %v327_v8, %v327_v8  ;;  %v1801_v17 = vpop.f32.mrb[8].mxu1  ;;  %v1247_v57 = vrot.slane %v1242_v53, %v1780_v41  ;;  %v1251_v61 = vrot.slane %v1242_v53, %v1786_v44  ;;  %v1265_v62 = vld [vmem:[%s1835_s8] sm:$0x7] }
 0x11c   :  { %v1799_v12 = vpop.f32.mrb[9].mxu0  ;;  %v1465_v21 = vpop.f32.mrb[9].mxu1  ;;  %v1270_v6 = vrot.slane %v1265_v62, %v1780_v41  ;;  %v1274_v8 = vrot.slane %v1265_v62, %v1786_v44  ;;  %v1255_v41 = vrot.slane %v1242_v53, %v1789_v46 }
 0x11d   :  { %1112 = vmatprep.mubr.bf16.mxu0 %v329_v7  ;;  %v525_v16 = vpop.f32.mrb[10].mxu0  ;;  %1153 = vmatprep.mubr.bf16.mxu1 %v331_v13  ;;  %v565_v23 = vpop.f32.mrb[10].mxu1 }
 0x11e   :  { %1113 = vmatmul.mubr.bf16.vlgmr.msra.gmra.mrb[12].mxu0 %v1797_v11  ;;  %v526_v20 = vpop.f32.mrb[11].mxu0  ;;  %1154 = vmatmul.mubr.bf16.vlgmr.msra.gmra.mrb[12].mxu1 %v1803_v18  ;;  %v1466_v25 = vpop.f32.mrb[11].mxu1 }
 0x11f   :  { %1418 = vmatpush3.bf16.msra.mxu0 %v1582_v9  ;;  %1194 = vmatprep.mubr.bf16.mxu0 %v329_v7 }
 0x120   :  { %1440 = vmatpush3.bf16.msra.mxu1 %v1584_v14  ;;  %1419 = vmatprep.subr.bf16.mxu0 %v1585_v15 }
 0x121   :  { %1234 = vmatprep.mubr.bf16.mxu1 %v331_v13  ;;  %1441 = vmatprep.subr.bf16.mxu1 %v1587_v19 }
 0x123   :  { %1420 = vmatpush3.bf16.msra.mxu0 %v1586_v22 }
 0x124   :  { %1421 = vmatprep.subr.bf16.mxu0 %v1589_v24  ;;  %1442 = vmatpush3.bf16.msra.mxu1 %v1588_v26 }
 0x125   :  { %1443 = vmatprep.subr.bf16.mxu1 %v1591_v27  ;;  %v1278_v27 = vrot.slane %v1265_v62, %v1789_v46 }
 0x127   :  { %1422 = vmatpush3.bf16.msra.mxu0 %v1590_v28 }
 0x128   :  { %1423 = vmatprep.subr.bf16.mxu0 %v1593_v29  ;;  %1444 = vmatpush3.bf16.msra.mxu1 %v1592_v30 }
 0x129   :  { %1445 = vmatprep.subr.bf16.mxu1 %v1595_v31  ;;  %v1414_v31 = vld [vmem:[#allocation2] ss:$0 sm:$0xff] }
 0x12b   :  { %1424 = vmatpush3.bf16.msra.mxu0 %v1594_v32 }
 0x12c   :  { %1425 = vmatprep.subr.bf16.mxu0 %v1597_v33  ;;  %1446 = vmatpush3.bf16.msra.mxu1 %v1596_v34 }
 0x12d   :  { %1447 = vmatprep.subr.bf16.mxu1 %v1599_v35 }
 0x12f   :  { %1426 = vmatpush3.bf16.msra.mxu0 %v1598_v36 }
 0x130   :  { %1427 = vmatprep.subr.bf16.mxu0 %v1601_v37  ;;  %1448 = vmatpush3.bf16.msra.mxu1 %v1600_v38 }
 0x131   :  { %1449 = vmatprep.subr.bf16.mxu1 %v1603_v39 }
 0x133   :  { %1428 = vmatpush3.bf16.msra.mxu0 %v1602_v40 }
 0x134   :  { %1429 = vmatprep.subr.bf16.mxu0 %v1605_v42  ;;  %1450 = vmatpush3.bf16.msra.mxu1 %v1604_v43 }
 0x135   :  { %1451 = vmatprep.subr.bf16.mxu1 %v1607_v45 }
 0x137   :  { %1430 = vmatpush3.bf16.msra.mxu0 %v1606_v47 }
 0x138   :  { %1431 = vmatprep.subr.bf16.mxu0 %v1609_v48  ;;  %1452 = vmatpush3.bf16.msra.mxu1 %v1608_v49 }
 0x139   :  { %1453 = vmatprep.subr.bf16.mxu1 %v1611_v50 }
 0x13b   :  { %1432 = vmatpush3.bf16.msra.mxu0 %v1610_v51 }
 0x13c   :  { %1454 = vmatpush3.bf16.msra.mxu1 %v1612_v52 }
 0x13e   :  { %1195 = vmatmul.mubr.bf16.vlgmr.msra.gmra.mrb[16].mxu0 %v1797_v11 }
 0x13f   :  { %1235 = vmatmul.mubr.bf16.vlgmr.msra.gmra.mrb[16].mxu1 %v1803_v18 }
 0x1f1   :  { %v1114_v54 = vpop.f32.mrb[12].mxu0  ;;  %v1155_v60 = vpop.f32.mrb[12].mxu1 }
 0x1f2   :  { %v1115_v55 = vadd.f32 %v1114_v54, %v1795_v10  ;;  %v1116_v56 = vpop.f32.mrb[13].mxu0  ;;  %v1157_v0 = vpop.f32.mrb[13].mxu1 }
 0x1f3   :  { %v1117_v58 = vadd.f32 %v1116_v56, %v1799_v12  ;;  %v1118_v59 = vpop.f32.mrb[14].mxu0  ;;  %v1159_v2 = vpop.f32.mrb[14].mxu1 }
 0x1f4   :  { %v1156_v63 = vadd.f32 %v1155_v60, %v1115_v55  ;;  %v1119_v5 = vpop.f32.mrb[15].mxu0  ;;  %v1160_v4 = vpop.f32.mrb[15].mxu1 }
 0x1f5   :  { %v1158_v1 = vadd.f32 %v1157_v0, %v1117_v58 }
 0x1f6   :  { %v1259_v3 = vadd.f32 %v1247_v57, %v1156_v63 }
 0x1f7   :  { %v1260_v7 = vadd.f32 %v1251_v61, %v1158_v1 }
 0x1f8   :  { %v1262_v9 = vmax.f32 %v1259_v3, 0.0 }
 0x1f9   :  { %v1263_v10 = vmax.f32 %v1260_v7, 0.0 }
 0x1fa   :  { %v1282_v11 = vmul.f32 %v1270_v6, %v1262_v9 }
 0x1fb   :  { %v1283_v12 = vmul.f32 %v1274_v8, %v1263_v10 }
 0x1fd   :  { %v1285_v13 = vadd.f32 %v1283_v12, %v1282_v11 }
 0x211   :  { %v1433_v14 = vpop.f32.mrb[16].mxu0 }
 0x212   :  { %v1434_v15 = vpop.f32.mrb[17].mxu0  ;;  %v1455_v19 = vpop.f32.mrb[16].mxu1 }
 0x213   :  { %v1435_v16 = vadd.f32 %v1434_v15, %v1433_v14  ;;  %v1436_v18 = vpop.f32.mrb[18].mxu0  ;;  %v1456_v21 = vpop.f32.mrb[17].mxu1 }
 0x214   :  { %v1437_v20 = vpop.f32.mrb[19].mxu0  ;;  %v1457_v23 = vadd.f32 %v1456_v21, %v1455_v19  ;;  %v1458_v24 = vpop.f32.mrb[18].mxu1 }
 0x215   :  { %v1197_v22 = vadd.f32 %v1435_v16, %v1801_v17  ;;  %v1459_v25 = vpop.f32.mrb[19].mxu1 }
 0x217   :  { %v1237_v44 = vadd.f32 %v1457_v23, %v1197_v22 }
 0x219   :  { %v1261_v26 = vadd.f32 %v1255_v41, %v1237_v44 }
 0x21b   :  { %v1264_v28 = vmax.f32 %v1261_v26, 0.0 }
 0x21d   :  { %v1284_v29 = vmul.f32 %v1278_v27, %v1264_v28 }
 0x21f   :  { %v1286_v30 = vadd.f32 %v1285_v13, %v1284_v29 }
 0x221   :  { %1287 = vadd.xlane.f32.xlu0 %v1286_v30 }
 0x2ae   :  { %v1288_v32 = vpop.xlane.xlu0 %1287 }
 0x2af   :  { %v1296_v33 = vadd.f32 %v1414_v31, %v1288_v32 }
 0x2b1   :  { %1298 = vst.msk [vmem:[%s1837_s10] sm:$0xff] %vm1297_vm4, %v1296_v33 }
 0x2b2   :  { %1303 = vsyncpa [#allocation4], 1 }
 0x2b3   :  { %1304 = vsyncpa [#allocation6], 1 }

</bundles_post_ra>
